<compile_context>
chip_gen: v7x
topology: tpu7x:2x2x1
jax: 0.10.0
libtpu: 0.0.40
codegen_flags: <defaults>
</compile_context>

<pallas_src>
import numpy as np
import jax
import jax.numpy as jnp
from jax.experimental import pallas as pl
from jax.experimental.pallas import tpu as pltpu

# ---- problem sizes (module hardcodes 256 -> 64 -> 3 channels, scale factor 4) ----
C_IN = 256
HID = 64
C_OUT = 3
SCALE = 4
H_IN = 4
W_IN = 4
H_OUT = H_IN * SCALE          # 16
W_OUT = W_IN * SCALE          # 16
P_IN = H_IN * W_IN            # 16 input pixels
P_OUT = H_OUT * W_OUT         # 256 output pixels
BN_EPS = 1e-5


def _upsample_matrix(in_size: int, scale: int) -> np.ndarray:
    """PyTorch nn.Upsample(mode='bilinear', align_corners=False) as a (out, in) matrix."""
    out_size = in_size * scale
    i = np.arange(out_size, dtype=np.float64)
    src = (i + 0.5) / scale - 0.5
    src = np.clip(src, 0.0, None)                 # PyTorch clamps negative coords to 0
    i0 = np.minimum(np.floor(src).astype(np.int64), in_size - 1)
    i1 = np.minimum(i0 + 1, in_size - 1)
    lam = src - i0
    m = np.zeros((out_size, in_size), dtype=np.float64)
    m[np.arange(out_size), i0] += 1.0 - lam
    m[np.arange(out_size), i1] += lam
    return m.astype(np.float32)


def _build_tap_matrices() -> np.ndarray:
    """(9, P_OUT, P_IN) matrices: fused upsample + zero-pad + im2col shift per 3x3 tap."""
    uh = _upsample_matrix(H_IN, SCALE)            # (H_OUT, H_IN)
    uw = _upsample_matrix(W_IN, SCALE)            # (W_OUT, W_IN)
    uh_pad = np.zeros((H_OUT + 2, H_IN), np.float32)
    uw_pad = np.zeros((W_OUT + 2, W_IN), np.float32)
    uh_pad[1:-1] = uh
    uw_pad[1:-1] = uw
    mats = []
    for dy in range(3):
        for dx in range(3):
            mats.append(np.kron(uh_pad[dy:dy + H_OUT], uw_pad[dx:dx + W_OUT]))
    return np.stack(mats, axis=0)                 # (9, 256, 16)


# ------------------------------- Pallas kernel -------------------------------------
def decoder_kernel(x_ref, wf_ref, ms_ref, bias_ref, o_ref):
    """x_ref: (B, P_IN, C_IN); wf_ref: (9, C_OUT, C_IN); ms_ref: (9, P_IN, P_OUT);
       bias_ref: (C_OUT, P_OUT); o_ref: (B, C_OUT, P_OUT)."""
    bsz = x_ref.shape[0]
    x = x_ref[...]                                            # (B, 16, 256)
    acc = jnp.zeros((bsz, C_OUT, P_OUT), jnp.float32)         # (B, 3, 256)
    for k in range(9):
        wf_k = jnp.broadcast_to(wf_ref[k], (bsz, C_OUT, C_IN))   # (B, 3, 256)
        ms_k = jnp.broadcast_to(ms_ref[k], (bsz, P_IN, P_OUT))   # (B, 16, 256)
        # Channel contraction first (reassociated): (B,3,256) x (B,16,256) -> (B,3,16)
        xw = jnp.einsum('bci,bpi->bcp', wf_k, x,
                        preferred_element_type=jnp.float32)
        # Fused upsample + pad + 3x3 tap shift: (B,3,16) x (B,16,256) -> (B,3,256)
        acc = acc + jnp.einsum('bcp,bpq->bcq', xw, ms_k,
                               preferred_element_type=jnp.float32)
    y = acc + bias_ref[...]                                   # bias (3,256) broadcast over B
    o_ref[...] = jnp.maximum(y, 0.0)                          # lane-dense (B, 3, 256) output


def simple_decoder_forward(x_nchw, params):
    """x_nchw: (N, 256, H_IN, W_IN) float32 -> (N, 3, H_OUT, W_OUT) float32."""
    ms_t, wf_t, bias_t = params
    n = x_nchw.shape[0]

    # Per-step batch: amortize per-grid-step overhead, but keep >=2 parallel steps (v7x 2xTC).
    if n <= 2:
        bsz = 1
    else:
        bsz = min(8, (n + 1) // 2)
    n_pad = ((n + bsz - 1) // bsz) * bsz

    # NCHW -> (N, H*W, C): lane-dense (C=256) input blocks.   (glue)
    x_flat = jnp.transpose(x_nchw, (0, 2, 3, 1)).reshape(n, P_IN, C_IN)
    if n_pad != n:
        x_flat = jnp.pad(x_flat, ((0, n_pad - n), (0, 0), (0, 0)))

    out = pl.pallas_call(
        decoder_kernel,
        out_shape=jax.ShapeDtypeStruct((n_pad, C_OUT, P_OUT), jnp.float32),
        grid_spec=pltpu.PrefetchScalarGridSpec(
            num_scalar_prefetch=0,
            grid=(n_pad // bsz,),
            in_specs=[
                pl.BlockSpec((bsz, P_IN, C_IN), lambda i: (i, 0, 0)),    # x block
                pl.BlockSpec((9, C_OUT, C_IN), lambda i: (0, 0, 0)),     # fused conv weights
                pl.BlockSpec((9, P_IN, P_OUT), lambda i: (0, 0, 0)),     # tap matrices (transposed)
                pl.BlockSpec((C_OUT, P_OUT), lambda i: (0, 0)),          # fused bias
            ],
            out_specs=pl.BlockSpec((bsz, C_OUT, P_OUT), lambda i: (i, 0, 0)),
        ),
        compiler_params=pltpu.CompilerParams(dimension_semantics=("parallel",)),
    )(x_flat, wf_t, ms_t, bias_t)

    # (N, 3, 256) is already NCHW-flattened -> just reshape (no transpose).
    return out[:n].reshape(n, C_OUT, H_OUT, W_OUT)


def make_params():
    """Returns (kernel_params, raw_params) with the linear tail folded host-side."""
    key = jax.random.PRNGKey(0)
    k1, k2, k3, k4, k5, k6 = jax.random.split(key, 6)

    # Conv2d(256, 64, 3, 1, 1, bias=False): PyTorch weight (64, 256, 3, 3)
    w_conv1 = 0.05 * jax.random.normal(k1, (HID, C_IN, 3, 3), jnp.float32)
    w1 = jnp.transpose(w_conv1, (2, 3, 1, 0)).reshape(9, C_IN, HID)   # tap k = dy*3 + dx

    # Conv2d(64, 3, 1, 1, bias=False): PyTorch weight (3, 64, 1, 1) -> (64, 3)
    w_conv2 = 0.05 * jax.random.normal(k2, (C_OUT, HID, 1, 1), jnp.float32)
    w2 = jnp.transpose(w_conv2[:, :, 0, 0], (1, 0))

    # BatchNorm2d(64), eval mode: y = (x - mean) / sqrt(var + eps) * gamma + beta
    gamma = jax.random.uniform(k3, (HID,), jnp.float32, 0.8, 1.2)
    beta = 0.1 * jax.random.normal(k4, (HID,), jnp.float32)
    running_mean = 0.1 * jax.random.normal(k5, (HID,), jnp.float32)
    running_var = jax.random.uniform(k6, (HID,), jnp.float32, 0.5, 1.5)
    bn_scale = gamma / jnp.sqrt(running_var + BN_EPS)                  # (64,)
    bn_shift = beta - running_mean * bn_scale                          # (64,)

    ms = jnp.asarray(_build_tap_matrices())                            # (9, 256, 16)

    # ---- fold conv3x3 -> BN(eval) -> conv1x1 into per-tap weights + bias (exact, all linear) ----
    wf = jnp.einsum('kih,h,hc->kic', w1, bn_scale, w2)                 # (9, 256, 3)
    wf_t = jnp.transpose(wf, (0, 2, 1))                                # (9, 3, 256)   lane-dense
    bias = bn_shift @ w2                                               # (3,)
    bias_t = jnp.tile(bias[:, None], (1, P_OUT))                       # (3, 256)      lane-dense
    ms_t = jnp.transpose(ms, (0, 2, 1))                                # (9, 16, 256)  lane-dense

    kernel_params = (ms_t, wf_t, bias_t)
    raw_params = (ms, w1, bn_scale, bn_shift, w2)
    return kernel_params, raw_params


def _reference_forward(x_nchw, raw_params):
    """Pure-JAX reference using the unfused (original-order) formulation."""
    ms, w1, bn_scale, bn_shift, w2 = raw_params
    n = x_nchw.shape[0]
    x = jnp.transpose(x_nchw, (0, 2, 3, 1)).reshape(n, P_IN, C_IN)       # (N, 16, 256)
    acc = jnp.einsum('kqp,bpi,kih->bqh', ms, x, w1)                      # (N, 256, 64)
    y = acc * bn_scale + bn_shift
    out = jnp.maximum(jnp.einsum('bqh,hc->bqc', y, w2), 0.0)             # (N, 256, 3)
    return jnp.transpose(out.reshape(n, H_OUT, W_OUT, C_OUT), (0, 3, 1, 2))


if __name__ == "__main__":
    kernel_params, raw_params = make_params()
    key_x = jax.random.PRNGKey(0)
    x = jax.random.normal(key_x, (2, C_IN, H_IN, W_IN), jnp.float32)   # NCHW, like PyTorch

    y = simple_decoder_forward(x, kernel_params)
    y = jax.block_until_ready(y)
    assert y.shape == (2, C_OUT, H_OUT, W_OUT), y.shape

    y_ref = _reference_forward(x, raw_params)
    assert jnp.allclose(y, y_ref, atol=1e-3, rtol=1e-3)
    print("KERNEL_OK")
</pallas_src>

<mosaic_0001>
module attributes {stable_mosaic.version = 11 : i64} {
  func.func @decoder_kernel(%arg0: i32, %arg1: memref<1x16x256xf32, #tpu.memory_space<vmem>>, %arg2: memref<9x3x256xf32, #tpu.memory_space<vmem>>, %arg3: memref<9x16x256xf32, #tpu.memory_space<vmem>>, %arg4: memref<3x256xf32, #tpu.memory_space<vmem>>, %arg5: memref<1x3x256xf32, #tpu.memory_space<vmem>>) attributes {dimension_semantics = [#tpu.dimension_semantics<parallel>], iteration_bounds = array<i64: 2>, scalar_prefetch = 0 : i64, scratch_operands = 0 : i64, tpu.core_type = #tpu.core_type<tc>, window_params = [{transform_indices = @transform_0, window_bounds = array<i64: 1, 16, 256>}, {pipeline_mode = #tpu.pipeline_mode<synchronous>, transform_indices = @transform_1, window_bounds = array<i64: 9, 3, 256>}, {pipeline_mode = #tpu.pipeline_mode<synchronous>, transform_indices = @transform_2, window_bounds = array<i64: 9, 16, 256>}, {pipeline_mode = #tpu.pipeline_mode<synchronous>, transform_indices = @transform_3, window_bounds = array<i64: 3, 256>}, {transform_indices = @transform_4, window_bounds = array<i64: 1, 3, 256>}]} {
    %c0 = arith.constant 0 : index
    %c0_0 = arith.constant 0 : index
    %c0_1 = arith.constant 0 : index
    %0 = vector.load %arg1[%c0, %c0_0, %c0_1] : memref<1x16x256xf32, #tpu.memory_space<vmem>>, vector<1x16x256xf32>
    %cst = arith.constant 0.000000e+00 : f32
    %1 = vector.broadcast %cst : f32 to vector<1x3x256xf32>
    %c0_2 = arith.constant 0 : index
    %c0_3 = arith.constant 0 : index
    %c0_4 = arith.constant 0 : index
    %2 = vector.load %arg2[%c0_2, %c0_3, %c0_4] : memref<9x3x256xf32, #tpu.memory_space<vmem>>, vector<1x3x256xf32>
    %3 = vector.shape_cast %2 : vector<1x3x256xf32> to vector<3x256xf32>
    %4 = vector.shape_cast %3 : vector<3x256xf32> to vector<1x3x256xf32>
    %c0_5 = arith.constant 0 : index
    %c0_6 = arith.constant 0 : index
    %c0_7 = arith.constant 0 : index
    %5 = vector.load %arg3[%c0_5, %c0_6, %c0_7] : memref<9x16x256xf32, #tpu.memory_space<vmem>>, vector<1x16x256xf32>
    %6 = vector.shape_cast %5 : vector<1x16x256xf32> to vector<16x256xf32>
    %7 = vector.shape_cast %6 : vector<16x256xf32> to vector<1x16x256xf32>
    "tpu.trace_start"() <{level = 10 : i32, message = "bci,bpi->bcp"}> : () -> ()
    %cst_8 = arith.constant dense<0.000000e+00> : vector<1x3x16xf32>
    %8 = tpu.matmul %4, %0, %cst_8 {dimension_numbers = #tpu.dot_dimension_numbers<[2], [2], [1], [1], [0, 0, 0, 1, 1, 1], [0], [0]>} : vector<1x3x256xf32>, vector<1x16x256xf32>, vector<1x3x16xf32> -> vector<1x3x16xf32>
    "tpu.trace_stop"() : () -> ()
    "tpu.trace_start"() <{level = 10 : i32, message = "bcp,bpq->bcq"}> : () -> ()
    %cst_9 = arith.constant dense<0.000000e+00> : vector<1x3x256xf32>
    %9 = tpu.matmul %8, %7, %cst_9 {dimension_numbers = #tpu.dot_dimension_numbers<[2], [1], [1], [2], [0, 0, 0, 1, 1, 2], [0], [0]>} : vector<1x3x16xf32>, vector<1x16x256xf32>, vector<1x3x256xf32> -> vector<1x3x256xf32>
    "tpu.trace_stop"() : () -> ()
    %10 = arith.addf %1, %9 : vector<1x3x256xf32>
    %c1 = arith.constant 1 : index
    %c0_10 = arith.constant 0 : index
    %c0_11 = arith.constant 0 : index
    %11 = vector.load %arg2[%c1, %c0_10, %c0_11] : memref<9x3x256xf32, #tpu.memory_space<vmem>>, vector<1x3x256xf32>
    %12 = vector.shape_cast %11 : vector<1x3x256xf32> to vector<3x256xf32>
    %13 = vector.shape_cast %12 : vector<3x256xf32> to vector<1x3x256xf32>
    %c1_12 = arith.constant 1 : index
    %c0_13 = arith.constant 0 : index
    %c0_14 = arith.constant 0 : index
    %14 = vector.load %arg3[%c1_12, %c0_13, %c0_14] : memref<9x16x256xf32, #tpu.memory_space<vmem>>, vector<1x16x256xf32>
    %15 = vector.shape_cast %14 : vector<1x16x256xf32> to vector<16x256xf32>
    %16 = vector.shape_cast %15 : vector<16x256xf32> to vector<1x16x256xf32>
    "tpu.trace_start"() <{level = 10 : i32, message = "bci,bpi->bcp"}> : () -> ()
    %cst_15 = arith.constant dense<0.000000e+00> : vector<1x3x16xf32>
    %17 = tpu.matmul %13, %0, %cst_15 {dimension_numbers = #tpu.dot_dimension_numbers<[2], [2], [1], [1], [0, 0, 0, 1, 1, 1], [0], [0]>} : vector<1x3x256xf32>, vector<1x16x256xf32>, vector<1x3x16xf32> -> vector<1x3x16xf32>
    "tpu.trace_stop"() : () -> ()
    "tpu.trace_start"() <{level = 10 : i32, message = "bcp,bpq->bcq"}> : () -> ()
    %cst_16 = arith.constant dense<0.000000e+00> : vector<1x3x256xf32>
    %18 = tpu.matmul %17, %16, %cst_16 {dimension_numbers = #tpu.dot_dimension_numbers<[2], [1], [1], [2], [0, 0, 0, 1, 1, 2], [0], [0]>} : vector<1x3x16xf32>, vector<1x16x256xf32>, vector<1x3x256xf32> -> vector<1x3x256xf32>
    "tpu.trace_stop"() : () -> ()
    %19 = arith.addf %10, %18 : vector<1x3x256xf32>
    %c2 = arith.constant 2 : index
    %c0_17 = arith.constant 0 : index
    %c0_18 = arith.constant 0 : index
    %20 = vector.load %arg2[%c2, %c0_17, %c0_18] : memref<9x3x256xf32, #tpu.memory_space<vmem>>, vector<1x3x256xf32>
    %21 = vector.shape_cast %20 : vector<1x3x256xf32> to vector<3x256xf32>
    %22 = vector.shape_cast %21 : vector<3x256xf32> to vector<1x3x256xf32>
    %c2_19 = arith.constant 2 : index
    %c0_20 = arith.constant 0 : index
    %c0_21 = arith.constant 0 : index
    %23 = vector.load %arg3[%c2_19, %c0_20, %c0_21] : memref<9x16x256xf32, #tpu.memory_space<vmem>>, vector<1x16x256xf32>
    %24 = vector.shape_cast %23 : vector<1x16x256xf32> to vector<16x256xf32>
    %25 = vector.shape_cast %24 : vector<16x256xf32> to vector<1x16x256xf32>
    "tpu.trace_start"() <{level = 10 : i32, message = "bci,bpi->bcp"}> : () -> ()
    %cst_22 = arith.constant dense<0.000000e+00> : vector<1x3x16xf32>
    %26 = tpu.matmul %22, %0, %cst_22 {dimension_numbers = #tpu.dot_dimension_numbers<[2], [2], [1], [1], [0, 0, 0, 1, 1, 1], [0], [0]>} : vector<1x3x256xf32>, vector<1x16x256xf32>, vector<1x3x16xf32> -> vector<1x3x16xf32>
    "tpu.trace_stop"() : () -> ()
    "tpu.trace_start"() <{level = 10 : i32, message = "bcp,bpq->bcq"}> : () -> ()
    %cst_23 = arith.constant dense<0.000000e+00> : vector<1x3x256xf32>
    %27 = tpu.matmul %26, %25, %cst_23 {dimension_numbers = #tpu.dot_dimension_numbers<[2], [1], [1], [2], [0, 0, 0, 1, 1, 2], [0], [0]>} : vector<1x3x16xf32>, vector<1x16x256xf32>, vector<1x3x256xf32> -> vector<1x3x256xf32>
    "tpu.trace_stop"() : () -> ()
    %28 = arith.addf %19, %27 : vector<1x3x256xf32>
    %c3 = arith.constant 3 : index
    %c0_24 = arith.constant 0 : index
    %c0_25 = arith.constant 0 : index
    %29 = vector.load %arg2[%c3, %c0_24, %c0_25] : memref<9x3x256xf32, #tpu.memory_space<vmem>>, vector<1x3x256xf32>
    %30 = vector.shape_cast %29 : vector<1x3x256xf32> to vector<3x256xf32>
    %31 = vector.shape_cast %30 : vector<3x256xf32> to vector<1x3x256xf32>
    %c3_26 = arith.constant 3 : index
    %c0_27 = arith.constant 0 : index
    %c0_28 = arith.constant 0 : index
    %32 = vector.load %arg3[%c3_26, %c0_27, %c0_28] : memref<9x16x256xf32, #tpu.memory_space<vmem>>, vector<1x16x256xf32>
    %33 = vector.shape_cast %32 : vector<1x16x256xf32> to vector<16x256xf32>
    %34 = vector.shape_cast %33 : vector<16x256xf32> to vector<1x16x256xf32>
    "tpu.trace_start"() <{level = 10 : i32, message = "bci,bpi->bcp"}> : () -> ()
    %cst_29 = arith.constant dense<0.000000e+00> : vector<1x3x16xf32>
    %35 = tpu.matmul %31, %0, %cst_29 {dimension_numbers = #tpu.dot_dimension_numbers<[2], [2], [1], [1], [0, 0, 0, 1, 1, 1], [0], [0]>} : vector<1x3x256xf32>, vector<1x16x256xf32>, vector<1x3x16xf32> -> vector<1x3x16xf32>
    "tpu.trace_stop"() : () -> ()
    "tpu.trace_start"() <{level = 10 : i32, message = "bcp,bpq->bcq"}> : () -> ()
    %cst_30 = arith.constant dense<0.000000e+00> : vector<1x3x256xf32>
    %36 = tpu.matmul %35, %34, %cst_30 {dimension_numbers = #tpu.dot_dimension_numbers<[2], [1], [1], [2], [0, 0, 0, 1, 1, 2], [0], [0]>} : vector<1x3x16xf32>, vector<1x16x256xf32>, vector<1x3x256xf32> -> vector<1x3x256xf32>
    "tpu.trace_stop"() : () -> ()
    %37 = arith.addf %28, %36 : vector<1x3x256xf32>
    %c4 = arith.constant 4 : index
    %c0_31 = arith.constant 0 : index
    %c0_32 = arith.constant 0 : index
    %38 = vector.load %arg2[%c4, %c0_31, %c0_32] : memref<9x3x256xf32, #tpu.memory_space<vmem>>, vector<1x3x256xf32>
    %39 = vector.shape_cast %38 : vector<1x3x256xf32> to vector<3x256xf32>
    %40 = vector.shape_cast %39 : vector<3x256xf32> to vector<1x3x256xf32>
    %c4_33 = arith.constant 4 : index
    %c0_34 = arith.constant 0 : index
    %c0_35 = arith.constant 0 : index
    %41 = vector.load %arg3[%c4_33, %c0_34, %c0_35] : memref<9x16x256xf32, #tpu.memory_space<vmem>>, vector<1x16x256xf32>
    %42 = vector.shape_cast %41 : vector<1x16x256xf32> to vector<16x256xf32>
    %43 = vector.shape_cast %42 : vector<16x256xf32> to vector<1x16x256xf32>
    "tpu.trace_start"() <{level = 10 : i32, message = "bci,bpi->bcp"}> : () -> ()
    %cst_36 = arith.constant dense<0.000000e+00> : vector<1x3x16xf32>
    %44 = tpu.matmul %40, %0, %cst_36 {dimension_numbers = #tpu.dot_dimension_numbers<[2], [2], [1], [1], [0, 0, 0, 1, 1, 1], [0], [0]>} : vector<1x3x256xf32>, vector<1x16x256xf32>, vector<1x3x16xf32> -> vector<1x3x16xf32>
    "tpu.trace_stop"() : () -> ()
    "tpu.trace_start"() <{level = 10 : i32, message = "bcp,bpq->bcq"}> : () -> ()
    %cst_37 = arith.constant dense<0.000000e+00> : vector<1x3x256xf32>
    %45 = tpu.matmul %44, %43, %cst_37 {dimension_numbers = #tpu.dot_dimension_numbers<[2], [1], [1], [2], [0, 0, 0, 1, 1, 2], [0], [0]>} : vector<1x3x16xf32>, vector<1x16x256xf32>, vector<1x3x256xf32> -> vector<1x3x256xf32>
    "tpu.trace_stop"() : () -> ()
    %46 = arith.addf %37, %45 : vector<1x3x256xf32>
    %c5 = arith.constant 5 : index
    %c0_38 = arith.constant 0 : index
    %c0_39 = arith.constant 0 : index
    %47 = vector.load %arg2[%c5, %c0_38, %c0_39] : memref<9x3x256xf32, #tpu.memory_space<vmem>>, vector<1x3x256xf32>
    %48 = vector.shape_cast %47 : vector<1x3x256xf32> to vector<3x256xf32>
    %49 = vector.shape_cast %48 : vector<3x256xf32> to vector<1x3x256xf32>
    %c5_40 = arith.constant 5 : index
    %c0_41 = arith.constant 0 : index
    %c0_42 = arith.constant 0 : index
    %50 = vector.load %arg3[%c5_40, %c0_41, %c0_42] : memref<9x16x256xf32, #tpu.memory_space<vmem>>, vector<1x16x256xf32>
    %51 = vector.shape_cast %50 : vector<1x16x256xf32> to vector<16x256xf32>
    %52 = vector.shape_cast %51 : vector<16x256xf32> to vector<1x16x256xf32>
    "tpu.trace_start"() <{level = 10 : i32, message = "bci,bpi->bcp"}> : () -> ()
    %cst_43 = arith.constant dense<0.000000e+00> : vector<1x3x16xf32>
    %53 = tpu.matmul %49, %0, %cst_43 {dimension_numbers = #tpu.dot_dimension_numbers<[2], [2], [1], [1], [0, 0, 0, 1, 1, 1], [0], [0]>} : vector<1x3x256xf32>, vector<1x16x256xf32>, vector<1x3x16xf32> -> vector<1x3x16xf32>
    "tpu.trace_stop"() : () -> ()
    "tpu.trace_start"() <{level = 10 : i32, message = "bcp,bpq->bcq"}> : () -> ()
    %cst_44 = arith.constant dense<0.000000e+00> : vector<1x3x256xf32>
    %54 = tpu.matmul %53, %52, %cst_44 {dimension_numbers = #tpu.dot_dimension_numbers<[2], [1], [1], [2], [0, 0, 0, 1, 1, 2], [0], [0]>} : vector<1x3x16xf32>, vector<1x16x256xf32>, vector<1x3x256xf32> -> vector<1x3x256xf32>
    "tpu.trace_stop"() : () -> ()
    %55 = arith.addf %46, %54 : vector<1x3x256xf32>
    %c6 = arith.constant 6 : index
    %c0_45 = arith.constant 0 : index
    %c0_46 = arith.constant 0 : index
    %56 = vector.load %arg2[%c6, %c0_45, %c0_46] : memref<9x3x256xf32, #tpu.memory_space<vmem>>, vector<1x3x256xf32>
    %57 = vector.shape_cast %56 : vector<1x3x256xf32> to vector<3x256xf32>
    %58 = vector.shape_cast %57 : vector<3x256xf32> to vector<1x3x256xf32>
    %c6_47 = arith.constant 6 : index
    %c0_48 = arith.constant 0 : index
    %c0_49 = arith.constant 0 : index
    %59 = vector.load %arg3[%c6_47, %c0_48, %c0_49] : memref<9x16x256xf32, #tpu.memory_space<vmem>>, vector<1x16x256xf32>
    %60 = vector.shape_cast %59 : vector<1x16x256xf32> to vector<16x256xf32>
    %61 = vector.shape_cast %60 : vector<16x256xf32> to vector<1x16x256xf32>
    "tpu.trace_start"() <{level = 10 : i32, message = "bci,bpi->bcp"}> : () -> ()
    %cst_50 = arith.constant dense<0.000000e+00> : vector<1x3x16xf32>
    %62 = tpu.matmul %58, %0, %cst_50 {dimension_numbers = #tpu.dot_dimension_numbers<[2], [2], [1], [1], [0, 0, 0, 1, 1, 1], [0], [0]>} : vector<1x3x256xf32>, vector<1x16x256xf32>, vector<1x3x16xf32> -> vector<1x3x16xf32>
    "tpu.trace_stop"() : () -> ()
    "tpu.trace_start"() <{level = 10 : i32, message = "bcp,bpq->bcq"}> : () -> ()
    %cst_51 = arith.constant dense<0.000000e+00> : vector<1x3x256xf32>
    %63 = tpu.matmul %62, %61, %cst_51 {dimension_numbers = #tpu.dot_dimension_numbers<[2], [1], [1], [2], [0, 0, 0, 1, 1, 2], [0], [0]>} : vector<1x3x16xf32>, vector<1x16x256xf32>, vector<1x3x256xf32> -> vector<1x3x256xf32>
    "tpu.trace_stop"() : () -> ()
    %64 = arith.addf %55, %63 : vector<1x3x256xf32>
    %c7 = arith.constant 7 : index
    %c0_52 = arith.constant 0 : index
    %c0_53 = arith.constant 0 : index
    %65 = vector.load %arg2[%c7, %c0_52, %c0_53] : memref<9x3x256xf32, #tpu.memory_space<vmem>>, vector<1x3x256xf32>
    %66 = vector.shape_cast %65 : vector<1x3x256xf32> to vector<3x256xf32>
    %67 = vector.shape_cast %66 : vector<3x256xf32> to vector<1x3x256xf32>
    %c7_54 = arith.constant 7 : index
    %c0_55 = arith.constant 0 : index
    %c0_56 = arith.constant 0 : index
    %68 = vector.load %arg3[%c7_54, %c0_55, %c0_56] : memref<9x16x256xf32, #tpu.memory_space<vmem>>, vector<1x16x256xf32>
    %69 = vector.shape_cast %68 : vector<1x16x256xf32> to vector<16x256xf32>
    %70 = vector.shape_cast %69 : vector<16x256xf32> to vector<1x16x256xf32>
    "tpu.trace_start"() <{level = 10 : i32, message = "bci,bpi->bcp"}> : () -> ()
    %cst_57 = arith.constant dense<0.000000e+00> : vector<1x3x16xf32>
    %71 = tpu.matmul %67, %0, %cst_57 {dimension_numbers = #tpu.dot_dimension_numbers<[2], [2], [1], [1], [0, 0, 0, 1, 1, 1], [0], [0]>} : vector<1x3x256xf32>, vector<1x16x256xf32>, vector<1x3x16xf32> -> vector<1x3x16xf32>
    "tpu.trace_stop"() : () -> ()
    "tpu.trace_start"() <{level = 10 : i32, message = "bcp,bpq->bcq"}> : () -> ()
    %cst_58 = arith.constant dense<0.000000e+00> : vector<1x3x256xf32>
    %72 = tpu.matmul %71, %70, %cst_58 {dimension_numbers = #tpu.dot_dimension_numbers<[2], [1], [1], [2], [0, 0, 0, 1, 1, 2], [0], [0]>} : vector<1x3x16xf32>, vector<1x16x256xf32>, vector<1x3x256xf32> -> vector<1x3x256xf32>
    "tpu.trace_stop"() : () -> ()
    %73 = arith.addf %64, %72 : vector<1x3x256xf32>
    %c8 = arith.constant 8 : index
    %c0_59 = arith.constant 0 : index
    %c0_60 = arith.constant 0 : index
    %74 = vector.load %arg2[%c8, %c0_59, %c0_60] : memref<9x3x256xf32, #tpu.memory_space<vmem>>, vector<1x3x256xf32>
    %75 = vector.shape_cast %74 : vector<1x3x256xf32> to vector<3x256xf32>
    %76 = vector.shape_cast %75 : vector<3x256xf32> to vector<1x3x256xf32>
    %c8_61 = arith.constant 8 : index
    %c0_62 = arith.constant 0 : index
    %c0_63 = arith.constant 0 : index
    %77 = vector.load %arg3[%c8_61, %c0_62, %c0_63] : memref<9x16x256xf32, #tpu.memory_space<vmem>>, vector<1x16x256xf32>
    %78 = vector.shape_cast %77 : vector<1x16x256xf32> to vector<16x256xf32>
    %79 = vector.shape_cast %78 : vector<16x256xf32> to vector<1x16x256xf32>
    "tpu.trace_start"() <{level = 10 : i32, message = "bci,bpi->bcp"}> : () -> ()
    %cst_64 = arith.constant dense<0.000000e+00> : vector<1x3x16xf32>
    %80 = tpu.matmul %76, %0, %cst_64 {dimension_numbers = #tpu.dot_dimension_numbers<[2], [2], [1], [1], [0, 0, 0, 1, 1, 1], [0], [0]>} : vector<1x3x256xf32>, vector<1x16x256xf32>, vector<1x3x16xf32> -> vector<1x3x16xf32>
    "tpu.trace_stop"() : () -> ()
    "tpu.trace_start"() <{level = 10 : i32, message = "bcp,bpq->bcq"}> : () -> ()
    %cst_65 = arith.constant dense<0.000000e+00> : vector<1x3x256xf32>
    %81 = tpu.matmul %80, %79, %cst_65 {dimension_numbers = #tpu.dot_dimension_numbers<[2], [1], [1], [2], [0, 0, 0, 1, 1, 2], [0], [0]>} : vector<1x3x16xf32>, vector<1x16x256xf32>, vector<1x3x256xf32> -> vector<1x3x256xf32>
    "tpu.trace_stop"() : () -> ()
    %82 = arith.addf %73, %81 : vector<1x3x256xf32>
    %c0_66 = arith.constant 0 : index
    %c0_67 = arith.constant 0 : index
    %83 = vector.load %arg4[%c0_66, %c0_67] : memref<3x256xf32, #tpu.memory_space<vmem>>, vector<3x256xf32>
    %84 = vector.shape_cast %83 : vector<3x256xf32> to vector<1x3x256xf32>
    %85 = arith.addf %82, %84 : vector<1x3x256xf32>
    %cst_68 = arith.constant 0.000000e+00 : f32
    %86 = vector.broadcast %cst_68 : f32 to vector<1x3x256xf32>
    %87 = arith.maximumf %85, %86 : vector<1x3x256xf32>
    %c0_69 = arith.constant 0 : index
    %c0_70 = arith.constant 0 : index
    %c0_71 = arith.constant 0 : index
    %88 = vector.load %arg5[%c0_69, %c0_70, %c0_71] : memref<1x3x256xf32, #tpu.memory_space<vmem>>, vector<1x3x256xf32>
    tpu.vector_store %arg5[%c0_69, %c0_70, %c0_71], %87 {strides = array<i32>} : memref<1x3x256xf32, #tpu.memory_space<vmem>>, vector<1x3x256xf32>,
    return
  }
  func.func @transform_0(%arg0: i32) -> (i32, i32, i32) {
    %c0_i32 = arith.constant 0 : i32
    %c0_i32_0 = arith.constant 0 : i32
    %c0_i32_1 = arith.constant 0 : i32
    return %arg0, %c0_i32, %c0_i32_0 : i32, i32, i32
  }
  func.func @transform_1(%arg0: i32) -> (i32, i32, i32) {
    %c0_i32 = arith.constant 0 : i32
    %c0_i32_0 = arith.constant 0 : i32
    %c0_i32_1 = arith.constant 0 : i32
    %c0_i32_2 = arith.constant 0 : i32
    return %c0_i32, %c0_i32_0, %c0_i32_1 : i32, i32, i32
  }
  func.func @transform_2(%arg0: i32) -> (i32, i32, i32) {
    %c0_i32 = arith.constant 0 : i32
    %c0_i32_0 = arith.constant 0 : i32
    %c0_i32_1 = arith.constant 0 : i32
    %c0_i32_2 = arith.constant 0 : i32
    return %c0_i32, %c0_i32_0, %c0_i32_1 : i32, i32, i32
  }
  func.func @transform_3(%arg0: i32) -> (i32, i32) {
    %c0_i32 = arith.constant 0 : i32
    %c0_i32_0 = arith.constant 0 : i32
    %c0_i32_1 = arith.constant 0 : i32
    return %c0_i32, %c0_i32_0 : i32, i32
  }
  func.func @transform_4(%arg0: i32) -> (i32, i32, i32) {
    %c0_i32 = arith.constant 0 : i32
    %c0_i32_0 = arith.constant 0 : i32
    %c0_i32_1 = arith.constant 0 : i32
    return %arg0, %c0_i32, %c0_i32_0 : i32, i32, i32
  }
}

</mosaic_0001>

<bundles_post_ra>
// kernel: tpu_custom_call.1
= control target key start
LH: loop header
LB: loop body
LE: loop exit
PB: predicated region body
PF: predicated region fallthrough
CT: control target
= control target key end

     0   :  { %9 = vsyncpa [#allocation3], 0  ;;  %s2322_s0 = inlined_call_operand.hbm [shape: f32[2,16,256], index: 0, kind: input, shape index: {}]   ;;  %s2323_s1 = inlined_call_operand.hbm [shape: f32[9,3,256], index: 1, kind: input, shape index: {}]   ;;  %s2324_s2 = inlined_call_operand.hbm [shape: f32[9,16,256], index: 2, kind: input, shape index: {}]   ;;  %s2325_s3 = inlined_call_operand.vmem [shape: f32[3,256], index: 3, kind: input, shape index: {}]   ;;  %s2326_s4 = inlined_call_operand.vmem [shape: f32[2,3,256], index: 4, kind: output, shape index: {}]  }
   0x1   :  { %11 = vsyncpa [#allocation3 + $0x1], 0 }
   0x2   :  { %12 = vsyncpa [#allocation5], 0  ;;  %s2098_s15 = smov 0   ;;  %s2100_s16 = smov 0  }
   0x3   :  { %s2102_s17 = smov 0   ;;  %s2104_s18 = smov 0  }
   0x4 LB: > { %s2117_s19 = sadd.s32 4294967295, %s2063_s18   ;;  %p38_p0 = scmp.ne.s32.totalorder %s2055_s16, %s2051_s15  ;;  %s2063_s18 = sphi %s2104_s18, %s2341_s18   ;;  %s2059_s17 = sphi %s2102_s17, %s2340_s17   ;;  %s2055_s16 = sphi %s2100_s16, %s2339_s16   ;;  %s2051_s15 = sphi %s2098_s15, %s2338_s15  }
   0x5   : > { %p2327_p1 = scmp.eq.s32.totalorder %s2117_s19, 0  ;;  %p1750_p2 = scmp.ge.s32.totalorder %s2063_s18, 1 }
   0x6   : > { %p138_p3 = scmp.lt.s32.totalorder %s2063_s18, 3  ;;  %s2065_s22 = smov [#allocation4]  }
   0x7   : > { %p2125_p4 = por %p2327_p1, %p38_p0  ;;  %s150_s23 = sshll.u32 %s2065_s22, 4  ;;  %s151_s23 = int_to_ptr.vmem [resolvable:$true] %s150_s23 }
   0x8   : > { %p2129_p5 = pnand %p1750_p2, %p138_p3  ;;  %s2066_s25 = smov [#allocation6]  }
   0x9   : > { %s2330_s20 = scalar_select %p2125_p4, 1, 0 }
   0xa   : > { %s2331_s21 = scalar_select %p2129_p5, 1, 0 }
   0xb   : > { %p1874_p6 = pneg %p2129_p5  ;;  %s163_s26 = sshll.u32 %s2066_s25, 4  ;;  %s2141_s26 = int_to_ptr.vmem [resolvable:$true] %s163_s26 }
   0xc   : > { %s1939_s29 = scalar_lea.hbm %s2323_s1, 1152 }
   0xd   : > { %p2137_p7 = pnand %p1874_p6, %p2327_p1  ;;  %p1940_p8 = scmp.ne.s32.totalorder %s2323_s1, %s1939_s29 }
   0xe   : > { %p1946_p12 = scmp.lt.u32.totalorder %s1939_s29, %s2323_s1 }
   0xf   : > { %p1941_p9 = pneg %p2137_p7 }
  0x11   : > { %p1942_p10 = pnand %p1941_p9, %p1940_p8 }
  0x13   : > { %p1943_p11 = pneg %p1942_p10 }
  0x15   : > { %p1948_p13 = pnand %p1946_p12, %p1943_p11 }
  0x17   : > { %1951 = shalt.err (!%p1948_p13)
}
  0x18   : > { %s1952_s8 = scalar_lea.vmem %s151_s23, 1152  ;;  %p1960_p6 = scmp.lt.s32.totalorder %s151_s23, %s151_s23 }
  0x19   : > { %p1953_p0 = scmp.ne.s32.totalorder %s151_s23, %s1952_s8  ;;  %p1961_p1 = scmp.lt.s32.totalorder %s1952_s8, %s1952_s8 }
  0x1b   : > { %p1955_p2 = pnand %p1953_p0, %p1941_p9  ;;  %p1962_p4 = por %p1961_p1, %p1960_p6 }
  0x1d   : > { %p1956_p3 = pneg %p1955_p2 }
  0x1f   : > { %p1963_p5 = pnand %p1962_p4, %p1956_p3 }
  0x21   : > { %1966 = shalt.err (!%p1963_p5)
}
  0x22   : > { %s2067_s9 = smov 128   ;;  %s2068_s10 = smov 8  }
  0x23   : > { %1877 = dma.hbm_to_vmem [thread:$0]  (!%p2137_p7), %s2323_s1, 1152, %s151_s23, [#allocation5], %s2067_s9, %s2067_s9, %s2068_s10  }
  0x24   : > { %s1967_s15 = scalar_lea.hbm %s2324_s2, 4608 }
  0x25   : > { %p1968_p8 = scmp.ne.s32.totalorder %s2324_s2, %s1967_s15  ;;  %p1974_p5 = scmp.lt.u32.totalorder %s1967_s15, %s2324_s2 }
  0x27   : > { %p1970_p1 = pnand %p1968_p8, %p1941_p9 }
  0x29   : > { %p1971_p4 = pneg %p1970_p1 }
  0x2b   : > { %p1976_p10 = pnand %p1974_p5, %p1971_p4 }
  0x2d   : > { %1979 = shalt.err (!%p1976_p10)
}
  0x2e   : > { %s1980_s23 = scalar_lea.vmem %s2141_s26, 4608  ;;  %p1988_p0 = scmp.lt.s32.totalorder %s2141_s26, %s2141_s26 }
  0x2f   : > { %p1981_p11 = scmp.ne.s32.totalorder %s2141_s26, %s1980_s23  ;;  %p1989_p2 = scmp.lt.s32.totalorder %s1980_s23, %s1980_s23 }
  0x31   : > { %p1983_p12 = pnand %p1981_p11, %p1941_p9  ;;  %p1990_p3 = por %p1989_p2, %p1988_p0 }
  0x33   : > { %p1984_p13 = pneg %p1983_p12 }
  0x35   : > { %p1991_p6 = pnand %p1990_p3, %p1984_p13 }
  0x37   : > { %1994 = shalt.err (!%p1991_p6)
}
  0x38   : > { %s2069_s29 = smov 256   ;;  %s2070_s30 = smov 16  }
  0x39   : > { %1880 = dma.hbm_to_vmem [thread:$0]  (!%p2137_p7), %s2324_s2, 4608, %s2141_s26, [#allocation5], %s2069_s29, %s2069_s29, %s2070_s30  }
  0x3a   : > { %s2194_s7 = sadd.s32 1, %s2063_s18   ;;  %s25_s9 = sadd.s32 1, %s2059_s17 }
  0x3b   : > { %s22_s8 = ssub.s32 %s2063_s18, %s2194_s7  ;;  %p32_p8 = scmp.ne.s32.totalorder %s2059_s17, %s2055_s16 }
  0x3c   : > { %p23_p9 = scmp.eq.s32.totalorder %s22_s8, 0  ;;  %p33_p1 = scmp.eq.s32.totalorder %s2063_s18, 0 }
  0x3d   : > { %p1887_p5 = scmp.lt.s32.totalorder %s2063_s18, 2  ;;  %s180_s24 = sand.u32 1, %s2059_s17  }
  0x3e   : > { %s2203_s10 = scalar_select %p23_p9, %s2059_s17, %s25_s9  }
  0x3f   : > { %p34_p4 = por %p33_p1, %p32_p8  ;;  %s1774_s11 = sshll.u32 %s2063_s18, 9 }
  0x40   : > { %s1754_s12 = sshll.u32 %s180_s24, 5  ;;  %s2211_s15 = scalar_lea.hbm %s2322_s0, %s1774_s11 }
  0x41   : > { %s184_s26 = scalar_lea.vmem [#allocation2], %s1754_s12  ;;  %p2213_p7 = pnand %p1887_p5, %p34_p4 }
  0x42   : > { %s191_s22 = sshll.u32 %s184_s26, 4  ;;  %s2219_s18 = scalar_lea.sflag [#allocation3], %s180_s24  ;;  %s2217_s22 = int_to_ptr.vmem [resolvable:$true] %s191_s22 }
  0x43   : > { %s1995_s27 = scalar_lea.hbm %s2211_s15, 512  ;;  %p1997_p11 = pneg %p2213_p7 }
  0x44   : > { %p1996_p10 = scmp.ne.s32.totalorder %s2211_s15, %s1995_s27  ;;  %s2000_s5 = scalar_lea.hbm %s2322_s0, 1024 }
  0x45   : > { %p2001_p0 = scmp.lt.u32.totalorder %s2211_s15, %s2322_s0  ;;  %p2002_p2 = scmp.lt.u32.totalorder %s2000_s5, %s1995_s27 }
  0x46   : > { %p1998_p12 = pnand %p1997_p11, %p1996_p10  ;;  %p2004_p6 = scmp.lt.u32.totalorder %s1995_s27, %s2211_s15 }
  0x47   : > { %p2003_p3 = por %p2002_p2, %p2001_p0 }
  0x48   : > { %p1999_p13 = pneg %p1998_p12 }
  0x49   : > { %p2005_p9 = por %p2004_p6, %p2003_p3 }
  0x4b   : > { %p2006_p8 = pnand %p2005_p9, %p1999_p13 }
  0x4d   : > { %2009 = shalt.err (!%p2006_p8)
}
  0x4e   : > { %s2010_s9 = scalar_lea.vmem %s2217_s22, 512  ;;  %s2071_s24 = smov [#allocation2]  }
  0x4f   : > { %p2011_p1 = scmp.ne.s32.totalorder %s2217_s22, %s2010_s9  ;;  %s2015_s11 = sshll.u32 %s2071_s24, 4  ;;  %s2016_s11 = int_to_ptr.vmem [resolvable:$false] %s2015_s11 }
  0x50   : > { %s2017_s12 = scalar_lea.vmem %s2016_s11, 1024  ;;  %p2018_p10 = scmp.lt.s32.totalorder %s2217_s22, %s2016_s11 }
  0x51   : > { %p2013_p4 = pnand %p2011_p1, %p1997_p11  ;;  %p2019_p12 = scmp.lt.s32.totalorder %s2017_s12, %s2010_s9 }
  0x53   : > { %p2014_p5 = pneg %p2013_p4  ;;  %p2020_p0 = por %p2019_p12, %p2018_p10 }
  0x55   : > { %p2021_p2 = pnand %p2020_p0, %p2014_p5 }
  0x57   : > { %2024 = shalt.err (!%p2021_p2)
}
  0x58   : > { %1884 = dma.hbm_to_vmem [thread:$0]  (!%p2213_p7), %s2211_s15, 512, %s2217_s22, %s2219_s18, %s2069_s29, %s2069_s29, %s2070_s30  }
  0x59   : > { %p2334_p11 = scmp.ne.s32.totalorder %s2331_s21, 0 }
  0x5a   : > { %s205_s13 = sand.u32 (!%p2334_p11), 1, %s2055_s16   ;;  %p2335_p13 = scmp.ne.s32.totalorder (!%p2334_p11), %s2330_s20, 0 }
  0x5b   : > { %203 = sbr.rel (%p2334_p11) target bundleno = 1043 (0x413), region = 36  ;;  %s1758_s14 = sshll.u32 (!%p2334_p11), %s205_s13, 5 }
  0x5c   : > { %s206_s26 = scalar_lea.sflag (!%p2334_p11), [#allocation3], %s205_s13  ;;  %s209_s27 = scalar_lea.vmem (!%p2334_p11), [#allocation2], %s1758_s14 }
  0x62   : > { %2042 = dma.done.wait (%p2335_p13), %s206_s26, 512  }
  0x63   : > { %2044 = vsyncadd (%p2335_p13), %s206_s26, 4294966784  ;;  %p2336_p3 = scmp.eq.s32.totalorder %s2117_s19, 0 }
  0x65   : > { %2046 = dma.done.wait (%p2336_p3), [#allocation5], 5760   ;;  %p2337_p6 = pmov %p2336_p3 }
  0x66   : > { %v248_v0 = vld [vmem:[%s209_s27 + $0x8] sm:$0xff]  ;;  %v250_v1 = vld [vmem:[%s209_s27 + $0x18] sm:$0xff]  ;;  %v247_v2 = vld [vmem:[%s209_s27] sm:$0xff]  ;;  %v2072_v20 = vmov 0.0   ;;  %vm409_vm0 = vcmask 130048   ;;  %p242_p7 = scmp.lt.s32.totalorder %s2117_s19, 1 }
  0x67   : > { %2048 = vsyncadd (%p2337_p6), [#allocation5], 4294961536  ;;  %v2261_v3 = vpack.c.bf16 %v250_v1, %v248_v0  ;;  %v249_v4 = vld [vmem:[%s209_s27 + $0x10] sm:$0xff]  ;;  %v251_v5 = vld [vmem:[#allocation4] sm:$0x77]  ;;  %477 = vmatprep.mubr.f32.mxu0 %v2072_v20 }
  0x68   : > { %v2263_v6 = vpack.c.bf16 %v249_v4, %v247_v2  ;;  %v257_v7 = vcombine.high %v251_v5, %v251_v5  ;;  %v330_v8 = vld [vmem:[#allocation4 + $0x8] sm:$0x77]  ;;  %v559_v10 = vld [vmem:[#allocation4 + $0x10] sm:$0x77]  ;;  %v715_v12 = vld [vmem:[#allocation4 + $0x18] sm:$0x77] }
  0x69   : > { %1777 = vmatprep.subr.bf16.mxu1 %v2261_v3  ;;  %v337_v9 = vcombine.high %v330_v8, %v330_v8  ;;  %v566_v11 = vcombine.high %v559_v10, %v559_v10  ;;  %v722_v13 = vcombine.high %v715_v12, %v715_v12  ;;  %v333_v14 = vld [vmem:[#allocation6 + $0x28] sm:$0xff]  ;;  %v335_v15 = vld [vmem:[#allocation6 + $0x38] sm:$0xff]  ;;  %v332_v16 = vld [vmem:[#allocation6 + $0x20] sm:$0xff]  ;;  %s2343_s19 = smov (!%p242_p7, %s2117_s19), 1 }
  0x6a   : > { %1779 = vmatpush1.bf16.xpose.msra.mxu1 %v2263_v6  ;;  %323 = vmatprep.mubr.f32.mxu1 %v257_v7  ;;  %v1784_v17 = vpack.c.bf16 %v335_v15, %v333_v14  ;;  %v334_v18 = vld [vmem:[#allocation6 + $0x30] sm:$0xff]  ;;  %v253_v21 = vld [vmem:[#allocation6 + $0x8] sm:$0xff]  ;;  %v255_v22 = vld [vmem:[#allocation6 + $0x18] sm:$0xff]  ;;  %s1775_s29 = sshll.u32 %s2343_s19, 3 }
  0x6b   : > { %1781 = vmatprep.subr.bf16.mxu1 %v2261_v3  ;;  %v1786_v19 = vpack.c.bf16 %v334_v18, %v332_v16  ;;  %v1788_v23 = vpack.c.bf16 %v255_v22, %v253_v21  ;;  %v1027_v24 = vld [vmem:[#allocation4 + $0x28] sm:$0x77]  ;;  %v1183_v25 = vld [vmem:[#allocation4 + $0x30] sm:$0x77]  ;;  %v1339_v28 = vld [vmem:[#allocation4 + $0x38] sm:$0x77]  ;;  %s246_s22 = scalar_lea.vmem %s2326_s4, %s1775_s29 }
  0x6c   : > { %1785 = vmatprep.subr.bf16.mxu0 %v1784_v17  ;;  %v1034_v26 = vcombine.high %v1027_v24, %v1027_v24  ;;  %v1190_v27 = vcombine.high %v1183_v25, %v1183_v25  ;;  %v1346_v29 = vcombine.high %v1339_v28, %v1339_v28  ;;  %v252_v32 = vld [vmem:[#allocation6] sm:$0xff]  ;;  %v254_v33 = vld [vmem:[#allocation6 + $0x10] sm:$0xff]  ;;  %v562_v34 = vld [vmem:[#allocation6 + $0x48] sm:$0xff] }
  0x6d   : > { %1787 = vmatpush1.bf16.msra.mxu0 %v1786_v19  ;;  %v564_v35 = vld [vmem:[#allocation6 + $0x58] sm:$0xff]  ;;  %v1790_v36 = vpack.c.bf16 %v254_v33, %v252_v32  ;;  %v561_v40 = vld [vmem:[#allocation6 + $0x40] sm:$0xff]  ;;  %v563_v41 = vld [vmem:[#allocation6 + $0x50] sm:$0xff] }
  0x6e   : > { %1789 = vmatprep.subr.bf16.mxu0 %v1788_v23  ;;  %v1796_v37 = vpack.c.bf16 %v564_v35, %v562_v34  ;;  %v718_v42 = vld [vmem:[#allocation6 + $0x68] sm:$0xff]  ;;  %v720_v43 = vld [vmem:[#allocation6 + $0x78] sm:$0xff]  ;;  %v1798_v44 = vpack.c.bf16 %v563_v41, %v561_v40  ;;  %v717_v48 = vld [vmem:[#allocation6 + $0x60] sm:$0xff] }
  0x6f   : > { %v1804_v45 = vpack.c.bf16 %v720_v43, %v718_v42  ;;  %v719_v49 = vld [vmem:[#allocation6 + $0x70] sm:$0xff]  ;;  %v871_v53 = vld [vmem:[#allocation4 + $0x20] sm:$0x77]  ;;  %v874_v54 = vld [vmem:[#allocation6 + $0x88] sm:$0xff] }
  0x70   : > { %v1806_v50 = vpack.c.bf16 %v719_v49, %v717_v48  ;;  %v876_v55 = vld [vmem:[#allocation6 + $0x98] sm:$0xff]  ;;  %v878_v56 = vcombine.high %v871_v53, %v871_v53  ;;  %v873_v58 = vld [vmem:[#allocation6 + $0x80] sm:$0xff]  ;;  %v875_v59 = vld [vmem:[#allocation6 + $0x90] sm:$0xff] }
  0x71   : > { %324 = vmatmul.mubr.f32.vlgmr.msra.gmra.mrb[0].mxu1 %v251_v5  ;;  %v1812_v57 = vpack.c.bf16 %v876_v55, %v874_v54  ;;  %v1814_v60 = vpack.c.bf16 %v875_v59, %v873_v58  ;;  %v1030_v61 = vld [vmem:[#allocation6 + $0xa8] sm:$0xff]  ;;  %v1032_v62 = vld [vmem:[#allocation6 + $0xb8] sm:$0xff]  ;;  %v1185_v16 = vld [vmem:[#allocation6 + $0xc0] sm:$0xff] }
  0x72   : > { %1783 = vmatpush1.bf16.xpose.msra.mxu1 %v2263_v6  ;;  %403 = vmatprep.mubr.f32.mxu1 %v337_v9  ;;  %v1820_v63 = vpack.c.bf16 %v1032_v62, %v1030_v61  ;;  %v1031_v9 = vld [vmem:[#allocation6 + $0xb0] sm:$0xff]  ;;  %v1342_v18 = vld [vmem:[#allocation6 + $0xe8] sm:$0xff]  ;;  %v1344_v19 = vld [vmem:[#allocation6 + $0xf8] sm:$0xff] }
  0x73   : > { %1793 = vmatprep.subr.bf16.mxu1 %v2261_v3  ;;  %v1187_v17 = vld [vmem:[#allocation6 + $0xd0] sm:$0xff]  ;;  %v1836_v22 = vpack.c.bf16 %v1344_v19, %v1342_v18  ;;  %v1341_v23 = vld [vmem:[#allocation6 + $0xe0] sm:$0xff]  ;;  %v1650_v35 = vld [vmem:[%s2325_s3] sm:$0x77] }
  0x74   : > { %v1830_v21 = vpack.c.bf16 %v1187_v17, %v1185_v16  ;;  %v1499_v32 = vld [vmem:[#allocation6 + $0x110] sm:$0xff] }
  0x79   : > { %404 = vmatmul.mubr.f32.vlgmr.msra.gmra.mrb[2].mxu1 %v330_v8  ;;  %v1029_v8 = vld [vmem:[#allocation6 + $0xa0] sm:$0xff] }
  0x7a   : > { %1795 = vmatpush1.bf16.xpose.msra.mxu1 %v2263_v6  ;;  %632 = vmatprep.mubr.f32.mxu1 %v566_v11  ;;  %v1188_v11 = vld [vmem:[#allocation6 + $0xd8] sm:$0xff] }
  0x7b   : > { %1801 = vmatprep.subr.bf16.mxu1 %v2261_v3 }
  0x81   : > { %633 = vmatmul.mubr.f32.vlgmr.msra.gmra.mrb[4].mxu1 %v559_v10  ;;  %v1186_v10 = vld [vmem:[#allocation6 + $0xc8] sm:$0xff] }
  0x82   : > { %1803 = vmatpush1.bf16.xpose.msra.mxu1 %v2263_v6  ;;  %788 = vmatprep.mubr.f32.mxu1 %v722_v13  ;;  %v1828_v13 = vpack.c.bf16 %v1188_v11, %v1186_v10 }
  0x83   : > { %1817 = vmatprep.subr.bf16.mxu1 %v2261_v3 }
  0x89   : > { %789 = vmatmul.mubr.f32.vlgmr.msra.gmra.mrb[6].mxu1 %v715_v12  ;;  %v1822_v12 = vpack.c.bf16 %v1031_v9, %v1029_v8 }
  0x8a   : > { %1819 = vmatpush1.bf16.xpose.msra.mxu1 %v2263_v6  ;;  %1100 = vmatprep.mubr.f32.mxu1 %v1034_v26  ;;  %v1495_v26 = vld [vmem:[#allocation4 + $0x40] sm:$0x77] }
  0x8b   : > { %1825 = vmatprep.subr.bf16.mxu1 %v2261_v3 }
  0x91   : > { %1101 = vmatmul.mubr.f32.vlgmr.msra.gmra.mrb[8].mxu1 %v1027_v24  ;;  %v1343_v24 = vld [vmem:[#allocation6 + $0xf0] sm:$0xff] }
  0x92   : > { %1827 = vmatpush1.bf16.xpose.msra.mxu1 %v2263_v6  ;;  %1256 = vmatprep.mubr.f32.mxu1 %v1190_v27  ;;  %v1498_v27 = vld [vmem:[#allocation6 + $0x108] sm:$0xff] }
  0x93   : > { %1833 = vmatprep.subr.bf16.mxu1 %v2261_v3 }
  0x99   : > { %1257 = vmatmul.mubr.f32.vlgmr.msra.gmra.mrb[10].mxu1 %v1183_v25  ;;  %v1838_v25 = vpack.c.bf16 %v1343_v24, %v1341_v23 }
  0x9a   : > { %1835 = vmatpush1.bf16.xpose.msra.mxu1 %v2263_v6  ;;  %1412 = vmatprep.mubr.f32.mxu1 %v1346_v29  ;;  %v1502_v29 = vcombine.high %v1495_v26, %v1495_v26 }
  0xa1   : > { %1413 = vmatmul.mubr.f32.vlgmr.msra.gmra.mrb[12].mxu1 %v1339_v28  ;;  %v1500_v28 = vld [vmem:[#allocation6 + $0x118] sm:$0xff] }
 0x144   : > { %v325_v30 = vpop.f32.mrb[0].mxu1 }
 0x145   : > { %v327_v31 = vpop.f32.mrb[1].mxu1 }
 0x146   : > { %v1497_v31 = vld [vmem:[#allocation6 + $0x100] sm:$0xff] }
 0x147   : > { %v1846_v33 = vpack.c.bf16 %v1499_v32, %v1497_v31 }
 0x14c   : > { %v405_v38 = vpop.f32.mrb[2].mxu1 }
 0x14d   : > { %v407_v39 = vpop.f32.mrb[3].mxu1  ;;  %1763 = vmatmul.mubr.msk.f32.vlgmr.msra.gmra.mrb[0].mxu0 %vm409_vm0, %v405_v38 }
 0x14e   : > { %1791 = vmatpush1.bf16.msra.mxu0 %v1790_v36  ;;  %551 = vmatprep.mubr.f32.mxu0 %v2072_v20  ;;  %v1652_v36 = vcombine.high %v1650_v35, %v1650_v35 }
 0x14f   : > { %1797 = vmatprep.subr.bf16.mxu0 %v1796_v37 }
 0x154   : > { %v634_v46 = vpop.f32.mrb[4].mxu1 }
 0x155   : > { %1764 = vmatmul.mubr.msk.f32.vlgmr.msra.gmra.mrb[0].mxu0 %vm409_vm0, %v325_v30  ;;  %v636_v47 = vpop.f32.mrb[5].mxu1  ;;  %v1844_v30 = vpack.c.bf16 %v1500_v28, %v1498_v27 }
 0x156   : > { %1799 = vmatpush1.bf16.msra.mxu0 %v1798_v44  ;;  %705 = vmatprep.mubr.f32.mxu0 %v2072_v20 }
 0x157   : > { %1805 = vmatprep.subr.bf16.mxu0 %v1804_v45 }
 0x15c   : > { %v790_v51 = vpop.f32.mrb[6].mxu1 }
 0x15d   : > { %1765 = vmatmul.mubr.msk.f32.vlgmr.msra.gmra.mrb[0].mxu0 %vm409_vm0, %v634_v46  ;;  %v792_v52 = vpop.f32.mrb[7].mxu1 }
 0x15e   : > { %1807 = vmatpush1.bf16.msra.mxu0 %v1806_v50  ;;  %861 = vmatprep.mubr.f32.mxu0 %v2072_v20 }
 0x15f   : > { %1809 = vmatprep.subr.bf16.mxu0 %v2261_v3 }
 0x164   : > { %v1102_v0 = vpop.f32.mrb[8].mxu1 }
 0x165   : > { %1766 = vmatmul.mubr.msk.f32.vlgmr.msra.gmra.mrb[0].mxu0 %vm409_vm0, %v790_v51  ;;  %v1104_v1 = vpop.f32.mrb[9].mxu1 }
 0x166   : > { %944 = vmatprep.mubr.f32.mxu0 %v878_v56 }
 0x167   : > { %1811 = vmatpush1.bf16.xpose.msra.mxu0 %v2263_v6 }
 0x168   : > { %1813 = vmatprep.subr.bf16.mxu0 %v1812_v57 }
 0x16c   : > { %v1258_v2 = vpop.f32.mrb[10].mxu1 }
 0x16d   : > { %v1260_v4 = vpop.f32.mrb[11].mxu1 }
 0x16e   : > { %945 = vmatmul.mubr.f32.vlgmr.msra.gmra.mrb[2].mxu0 %v871_v53 }
 0x16f   : > { %1815 = vmatpush1.bf16.msra.mxu0 %v1814_v60  ;;  %1017 = vmatprep.mubr.f32.mxu0 %v2072_v20 }
 0x170   : > { %1821 = vmatprep.subr.bf16.mxu0 %v1820_v63 }
 0x174   : > { %v1414_v5 = vpop.f32.mrb[12].mxu1 }
 0x175   : > { %v1416_v7 = vpop.f32.mrb[13].mxu1 }
 0x241   : > { %v946_v14 = vpop.f32.mrb[2].mxu0 }
 0x242   : > { %v948_v15 = vpop.f32.mrb[3].mxu0  ;;  %1767 = vmatmul.mubr.msk.f32.vlgmr.msra.gmra.mrb[0].mxu0 %vm409_vm0, %v946_v14 }
 0x243   : > { %1823 = vmatpush1.bf16.msra.mxu0 %v1822_v12  ;;  %1173 = vmatprep.mubr.f32.mxu0 %v2072_v20 }
 0x244   : > { %1829 = vmatprep.subr.bf16.mxu0 %v1828_v13 }
 0x24a   : > { %1768 = vmatmul.mubr.msk.f32.vlgmr.msra.gmra.mrb[0].mxu0 %vm409_vm0, %v1102_v0 }
 0x24b   : > { %1831 = vmatpush1.bf16.msra.mxu0 %v1830_v21  ;;  %1329 = vmatprep.mubr.f32.mxu0 %v2072_v20 }
 0x24c   : > { %1837 = vmatprep.subr.bf16.mxu0 %v1836_v22 }
 0x252   : > { %1769 = vmatmul.mubr.msk.f32.vlgmr.msra.gmra.mrb[0].mxu0 %vm409_vm0, %v1258_v2 }
 0x253   : > { %1839 = vmatpush1.bf16.msra.mxu0 %v1838_v25  ;;  %1485 = vmatprep.mubr.f32.mxu0 %v2072_v20 }
 0x254   : > { %1841 = vmatprep.subr.bf16.mxu0 %v2261_v3 }
 0x25a   : > { %1770 = vmatmul.mubr.msk.f32.vlgmr.msra.gmra.mrb[0].mxu0 %vm409_vm0, %v1414_v5 }
 0x25b   : > { %1568 = vmatprep.mubr.f32.mxu0 %v1502_v29 }
 0x25c   : > { %1843 = vmatpush1.bf16.xpose.msra.mxu0 %v2263_v6 }
 0x25d   : > { %1845 = vmatprep.subr.bf16.mxu0 %v1844_v30 }
 0x263   : > { %1569 = vmatmul.mubr.f32.vlgmr.msra.gmra.mrb[4].mxu0 %v1495_v26 }
 0x264   : > { %1847 = vmatpush1.bf16.msra.mxu0 %v1846_v33  ;;  %1641 = vmatprep.mubr.f32.mxu0 %v2072_v20 }
 0x336   : > { %v1570_v3 = vpop.f32.mrb[4].mxu0 }
 0x337   : > { %v1572_v34 = vpop.f32.mrb[5].mxu0  ;;  %1771 = vmatmul.mubr.msk.f32.vlgmr.msra.gmra.mrb[0].mxu0 %vm409_vm0, %v1570_v3 }
 0x40a   : > { %v1643_v6 = vpop.f32.mrb[0].mxu0 }
 0x40b   : > { %v1654_v37 = vadd.f32 %v1650_v35, %v1643_v6  ;;  %v1645_v38 = vpop.f32.mrb[1].mxu0 }
 0x40c   : > { %v1655_v39 = vadd.f32 %v1652_v36, %v1645_v38 }
 0x40d   : > { %v1656_v40 = vmax.f32 %v1654_v37, 0.0 }
 0x40e   : > { %v1657_v41 = vmax.f32 %v1655_v39, 0.0 }
 0x410   : > { %v1660_v20 = vcombine.low %v1656_v40, %v1657_v41 }
 0x412   : > { %1662 = vst [vmem:[%s246_s22] sm:$0x77] %v1660_v20 }
 0x413 PF: > { %p15_p9 = scmp.ge.s32.totalorder %s2194_s7, 4   ;;  %s2338_s15 = smov %s2055_s16 }
 0x414   : > { %s2339_s16 = smov %s2059_s17  ;;  %s2340_s17 = smov %s2203_s10 }
 0x415   : > { %s2341_s18 = smov %s2194_s7  ;;  %17 = sbr.rel (!%p15_p9) target bundleno = 4 (0x4), region = 100 }
 0x41c   :  { %1684 = vsyncpa [#allocation3], 1 }
 0x41d   :  { %1686 = vsyncpa [#allocation3 + $0x1], 1 }
 0x41e   :  { %1687 = vsyncpa [#allocation5], 1 }

</bundles_post_ra>
